<compile_context>
chip_gen: v7x
topology: tpu7x:2x2x1
jax: 0.10.0
libtpu: 0.0.40
codegen_flags: <defaults>
</compile_context>

<pallas_src>
import jax
import jax.numpy as jnp
from jax.experimental import pallas as pl
from jax.experimental.pallas import tpu as pltpu

NUM_CLASSES = 3
PAD_CLASSES = 8    # narrow lane-padded output: 32 B/row f32 writeback (vs 512 B at 128 lanes)
HID = 128          # lin1 / ResNet width; lin7 out + lin8 in padded 64 -> 128


def fcc_kernel(x_ref,
               w1_ref, b1_ref,
               w2a_ref, b2a_ref,
               w2b_ref, b2b_ref,
               w7_ref, b7_ref,
               w8_ref, b8_ref,
               out_ref):
    bf16 = jnp.bfloat16
    x = x_ref[...].astype(bf16)

    # lin1 + ReLU   (bf16 MXU matmul, f32 accumulate + bias + ReLU)
    h = jnp.dot(x, w1_ref[...], preferred_element_type=jnp.float32) + b1_ref[...]
    h = jnp.maximum(h, 0.0)

    # ResNet block: lin2b(relu(lin2a(h))) + h, then ReLU
    r = jnp.dot(h.astype(bf16), w2a_ref[...],
                preferred_element_type=jnp.float32) + b2a_ref[...]
    r = jnp.maximum(r, 0.0)
    h = jnp.dot(r.astype(bf16), w2b_ref[...],
                preferred_element_type=jnp.float32) + b2b_ref[...] + h
    h = jnp.maximum(h, 0.0)

    # Dropout(0.1): identity in eval/inference mode.
    # TODO(synk): training-mode dropout (pltpu.prng_random_bits mask) not implemented.

    # lin7 + ReLU  (output padded 64 -> 128 with zero columns; padded lanes stay 0)
    h = jnp.dot(h.astype(bf16), w7_ref[...],
                preferred_element_type=jnp.float32) + b7_ref[...]
    h = jnp.maximum(h, 0.0)

    # lin8 (padded to PAD_CLASSES lanes; padded lanes carry bias -1e30 -> no mask needed)
    logits = jnp.dot(h.astype(bf16), w8_ref[...],
                     preferred_element_type=jnp.float32) + b8_ref[...]

    # log_softmax over the class axis (padded lanes exp() to exactly 0).
    m = jnp.max(logits, axis=-1, keepdims=True)
    z = logits - m
    lse = jnp.log(jnp.sum(jnp.exp(z), axis=-1, keepdims=True))
    out_ref[...] = (z - lse).astype(out_ref.dtype)


def _round_up(n, m):
    return ((n + m - 1) // m) * m


def _choose_batch_tile(B, tile_b):
    """Pick a batch tile that (a) avoids padding x whenever possible, (b) yields
    >=2 grid steps for medium/large B (v7x megacore), (c) stays large enough to
    amortize the ~0.35us per-step overhead."""
    tile_b = max(8, (tile_b // 8) * 8)
    tb_cap = min(tile_b, _round_up(pl.cdiv(B, 2), 8))  # >=2 steps once B >= 16
    for t in range(tb_cap, 7, -8):                     # largest mult-of-8 divisor of B
        if B % t == 0:
            if 4 * t >= tb_cap:                        # reject if it fragments the grid
                return t, B
            break
    if B <= tile_b:
        return B, B                                    # single full-extent tile: no padding
    return tb_cap, _round_up(B, tb_cap)                # rare fallback: pad ragged tail


def fcc_forward(x, params, tile_b=2048):
    """x: (B, D_in) float32. params: dict of (in,out) f32 weights and (1,out) f32 biases."""
    B, D_in = x.shape
    bf16 = jnp.bfloat16

    # Weights pre-cast to bf16 for the MXU; biases stay f32.
    w1 = params["w1"].astype(bf16)
    w2a = params["w2a"].astype(bf16)
    w2b = params["w2b"].astype(bf16)
    b1, b2a, b2b = params["b1"], params["b2a"], params["b2b"]

    d7 = params["w7"].shape[1]  # 64
    # Pad lin7 output / lin8 input to HID lanes (zeros -> numerically exact).
    w7 = jnp.zeros((HID, HID), jnp.float32).at[:, :d7].set(params["w7"]).astype(bf16)
    b7 = jnp.zeros((1, HID), jnp.float32).at[:, :d7].set(params["b7"])
    # Final projection padded to PAD_CLASSES lanes; padded class lanes get a large
    # negative bias so exp() is exactly 0 (mask baked into the bias, no kernel work).
    w8 = jnp.zeros((HID, PAD_CLASSES), jnp.float32)
    w8 = w8.at[:d7, :NUM_CLASSES].set(params["w8"]).astype(bf16)
    b8 = jnp.full((1, PAD_CLASSES), -1e30, jnp.float32)
    b8 = b8.at[:, :NUM_CLASSES].set(params["b8"])

    tb, b_pad = _choose_batch_tile(B, tile_b)
    if b_pad != B:
        x = jnp.pad(x, ((0, b_pad - B), (0, 0)))
    grid = (b_pad // tb,)

    def tiled(shape):
        # Streams over the batch axis (double-buffered by the Pallas pipeline).
        return pl.BlockSpec(shape, lambda i: (i, 0))

    def resident(shape):
        # Same block every grid step -> weights/biases stay VMEM-resident.
        return pl.BlockSpec(shape, lambda i: (0, 0))

    operands = (x, w1, b1, w2a, b2a, w2b, b2b, w7, b7, w8, b8)
    in_specs = [tiled((tb, D_in))] + [resident(op.shape) for op in operands[1:]]
    out_spec = tiled((tb, PAD_CLASSES))

    flops = 2 * b_pad * (D_in * HID + 3 * HID * HID + HID * PAD_CLASSES)
    param_bytes = sum(int(op.size) * op.dtype.itemsize for op in operands[1:])
    bytes_accessed = b_pad * D_in * 4 + b_pad * PAD_CLASSES * 4 + param_bytes
    transcendentals = b_pad * (PAD_CLASSES + 1)

    out = pl.pallas_call(
        fcc_kernel,
        grid=grid,
        out_shape=jax.ShapeDtypeStruct((b_pad, PAD_CLASSES), jnp.float32),
        in_specs=in_specs,
        out_specs=out_spec,
        compiler_params=pltpu.CompilerParams(
            dimension_semantics=("parallel",)),
        cost_estimate=pl.CostEstimate(flops=flops,
                                      bytes_accessed=bytes_accessed,
                                      transcendentals=transcendentals),
    )(*operands)

    return out[:B, :NUM_CLASSES]


def init_params(key, d_in):
    """Deterministic parameter init (PyTorch Linear shapes, stored transposed)."""
    ks = jax.random.split(key, 10)

    def lin(kw, kb, fan_in, fan_out):
        bound = 1.0 / jnp.sqrt(fan_in)
        w = jax.random.uniform(kw, (fan_in, fan_out), jnp.float32, -bound, bound)
        b = jax.random.uniform(kb, (1, fan_out), jnp.float32, -bound, bound)
        return w, b

    w1, b1 = lin(ks[0], ks[1], d_in, 128)
    w2a, b2a = lin(ks[2], ks[3], 128, 128)
    w2b, b2b = lin(ks[4], ks[5], 128, 128)
    w7, b7 = lin(ks[6], ks[7], 128, 64)
    w8, b8 = lin(ks[8], ks[9], 64, 3)
    return dict(w1=w1, b1=b1, w2a=w2a, b2a=b2a, w2b=w2b, b2b=b2b,
                w7=w7, b7=b7, w8=w8, b8=b8)


def fcc_reference(x, p):
    """Pure-JAX reference mirroring the kernel's bf16-matmul / f32-accumulate math."""
    bf16 = jnp.bfloat16

    def mm(a, w):
        return jax.lax.dot(a.astype(bf16), w.astype(bf16),
                           preferred_element_type=jnp.float32)

    h = jnp.maximum(mm(x, p["w1"]) + p["b1"], 0.0)
    r = jnp.maximum(mm(h, p["w2a"]) + p["b2a"], 0.0)
    h = mm(r, p["w2b"]) + p["b2b"] + h
    h = jnp.maximum(h, 0.0)
    h = jnp.maximum(mm(h, p["w7"]) + p["b7"], 0.0)
    logits = mm(h, p["w8"]) + p["b8"]
    return jax.nn.log_softmax(logits, axis=1)


if __name__ == "__main__":
    key = jax.random.PRNGKey(0)
    k_x, k_p = jax.random.split(key)

    B, D_in = 8, 32
    x = jax.random.normal(k_x, (B, D_in), jnp.float32)
    params = init_params(k_p, D_in)

    out = jax.block_until_ready(fcc_forward(x, params))
    ref = fcc_reference(x, params)

    assert out.shape == (B, NUM_CLASSES)
    assert jnp.all(jnp.isfinite(out))
    assert jnp.allclose(out, ref, atol=2e-3, rtol=2e-3)
    # log_softmax rows should exponentiate to ~1
    assert jnp.allclose(jnp.sum(jnp.exp(out), axis=1), 1.0, atol=1e-4)

    # Exercise the other tiling paths: full-extent single tile (B not a multiple
    # of 8, no padding) and a multi-step grid (tile divides B exactly).
    for b_extra in (10, 24):
        xe = jax.random.normal(jax.random.PRNGKey(b_extra), (b_extra, D_in), jnp.float32)
        oe = jax.block_until_ready(fcc_forward(xe, params))
        re = fcc_reference(xe, params)
        assert oe.shape == (b_extra, NUM_CLASSES)
        assert jnp.allclose(oe, re, atol=2e-3, rtol=2e-3)

    print("KERNEL_OK")
</pallas_src>

<mosaic_0001>
module attributes {stable_mosaic.version = 11 : i64} {
  func.func @fcc_kernel(%arg0: i32, %arg1: memref<8x32xf32, #tpu.memory_space<vmem>>, %arg2: memref<32x128xbf16, #tpu.memory_space<vmem>>, %arg3: memref<1x128xf32, #tpu.memory_space<vmem>>, %arg4: memref<128x128xbf16, #tpu.memory_space<vmem>>, %arg5: memref<1x128xf32, #tpu.memory_space<vmem>>, %arg6: memref<128x128xbf16, #tpu.memory_space<vmem>>, %arg7: memref<1x128xf32, #tpu.memory_space<vmem>>, %arg8: memref<128x128xbf16, #tpu.memory_space<vmem>>, %arg9: memref<1x128xf32, #tpu.memory_space<vmem>>, %arg10: memref<128x8xbf16, #tpu.memory_space<vmem>>, %arg11: memref<1x8xf32, #tpu.memory_space<vmem>>, %arg12: memref<8x8xf32, #tpu.memory_space<vmem>>) attributes {dimension_semantics = [#tpu.dimension_semantics<parallel>], iteration_bounds = array<i64: 1>, scalar_prefetch = 0 : i64, scratch_operands = 0 : i64, tpu.core_type = #tpu.core_type<tc>, window_params = [{transform_indices = @transform_0, window_bounds = array<i64: 8, 32>}, {pipeline_mode = #tpu.pipeline_mode<synchronous>, transform_indices = @transform_1, window_bounds = array<i64: 32, 128>}, {pipeline_mode = #tpu.pipeline_mode<synchronous>, transform_indices = @transform_2, window_bounds = array<i64: 1, 128>}, {pipeline_mode = #tpu.pipeline_mode<synchronous>, transform_indices = @transform_3, window_bounds = array<i64: 128, 128>}, {pipeline_mode = #tpu.pipeline_mode<synchronous>, transform_indices = @transform_4, window_bounds = array<i64: 1, 128>}, {pipeline_mode = #tpu.pipeline_mode<synchronous>, transform_indices = @transform_5, window_bounds = array<i64: 128, 128>}, {pipeline_mode = #tpu.pipeline_mode<synchronous>, transform_indices = @transform_6, window_bounds = array<i64: 1, 128>}, {pipeline_mode = #tpu.pipeline_mode<synchronous>, transform_indices = @transform_7, window_bounds = array<i64: 128, 128>}, {pipeline_mode = #tpu.pipeline_mode<synchronous>, transform_indices = @transform_8, window_bounds = array<i64: 1, 128>}, {pipeline_mode = #tpu.pipeline_mode<synchronous>, transform_indices = @transform_9, window_bounds = array<i64: 128, 8>}, {pipeline_mode = #tpu.pipeline_mode<synchronous>, transform_indices = @transform_10, window_bounds = array<i64: 1, 8>}, {transform_indices = @transform_11, window_bounds = array<i64: 8, 8>}]} {
    %c0 = arith.constant 0 : index
    %c0_0 = arith.constant 0 : index
    %0 = vector.load %arg1[%c0, %c0_0] : memref<8x32xf32, #tpu.memory_space<vmem>>, vector<8x32xf32>
    %1 = arith.truncf %0 : vector<8x32xf32> to vector<8x32xbf16>
    %c0_1 = arith.constant 0 : index
    %c0_2 = arith.constant 0 : index
    %2 = vector.load %arg2[%c0_1, %c0_2] : memref<32x128xbf16, #tpu.memory_space<vmem>>, vector<32x128xbf16>
    %cst = arith.constant dense<0.000000e+00> : vector<8x128xf32>
    %3 = tpu.matmul %1, %2, %cst {dimension_numbers = #tpu.dot_dimension_numbers<[1], [0], [0], [1], [0, 0, 1, 1], [], []>} : vector<8x32xbf16>, vector<32x128xbf16>, vector<8x128xf32> -> vector<8x128xf32>
    %c0_3 = arith.constant 0 : index
    %c0_4 = arith.constant 0 : index
    %4 = vector.load %arg3[%c0_3, %c0_4] : memref<1x128xf32, #tpu.memory_space<vmem>>, vector<1x128xf32>
    %5 = vector.broadcast %4 : vector<1x128xf32> to vector<8x128xf32>
    %6 = arith.addf %3, %5 : vector<8x128xf32>
    %cst_5 = arith.constant 0.000000e+00 : f32
    %7 = vector.broadcast %cst_5 : f32 to vector<8x128xf32>
    %8 = arith.maximumf %6, %7 : vector<8x128xf32>
    %9 = arith.truncf %8 : vector<8x128xf32> to vector<8x128xbf16>
    %c0_6 = arith.constant 0 : index
    %c0_7 = arith.constant 0 : index
    %10 = vector.load %arg4[%c0_6, %c0_7] : memref<128x128xbf16, #tpu.memory_space<vmem>>, vector<128x128xbf16>
    %cst_8 = arith.constant dense<0.000000e+00> : vector<8x128xf32>
    %11 = tpu.matmul %9, %10, %cst_8 {dimension_numbers = #tpu.dot_dimension_numbers<[1], [0], [0], [1], [0, 0, 1, 1], [], []>} : vector<8x128xbf16>, vector<128x128xbf16>, vector<8x128xf32> -> vector<8x128xf32>
    %c0_9 = arith.constant 0 : index
    %c0_10 = arith.constant 0 : index
    %12 = vector.load %arg5[%c0_9, %c0_10] : memref<1x128xf32, #tpu.memory_space<vmem>>, vector<1x128xf32>
    %13 = vector.broadcast %12 : vector<1x128xf32> to vector<8x128xf32>
    %14 = arith.addf %11, %13 : vector<8x128xf32>
    %cst_11 = arith.constant 0.000000e+00 : f32
    %15 = vector.broadcast %cst_11 : f32 to vector<8x128xf32>
    %16 = arith.maximumf %14, %15 : vector<8x128xf32>
    %17 = arith.truncf %16 : vector<8x128xf32> to vector<8x128xbf16>
    %c0_12 = arith.constant 0 : index
    %c0_13 = arith.constant 0 : index
    %18 = vector.load %arg6[%c0_12, %c0_13] : memref<128x128xbf16, #tpu.memory_space<vmem>>, vector<128x128xbf16>
    %cst_14 = arith.constant dense<0.000000e+00> : vector<8x128xf32>
    %19 = tpu.matmul %17, %18, %cst_14 {dimension_numbers = #tpu.dot_dimension_numbers<[1], [0], [0], [1], [0, 0, 1, 1], [], []>} : vector<8x128xbf16>, vector<128x128xbf16>, vector<8x128xf32> -> vector<8x128xf32>
    %c0_15 = arith.constant 0 : index
    %c0_16 = arith.constant 0 : index
    %20 = vector.load %arg7[%c0_15, %c0_16] : memref<1x128xf32, #tpu.memory_space<vmem>>, vector<1x128xf32>
    %21 = vector.broadcast %20 : vector<1x128xf32> to vector<8x128xf32>
    %22 = arith.addf %19, %21 : vector<8x128xf32>
    %23 = arith.addf %22, %8 : vector<8x128xf32>
    %cst_17 = arith.constant 0.000000e+00 : f32
    %24 = vector.broadcast %cst_17 : f32 to vector<8x128xf32>
    %25 = arith.maximumf %23, %24 : vector<8x128xf32>
    %26 = arith.truncf %25 : vector<8x128xf32> to vector<8x128xbf16>
    %c0_18 = arith.constant 0 : index
    %c0_19 = arith.constant 0 : index
    %27 = vector.load %arg8[%c0_18, %c0_19] : memref<128x128xbf16, #tpu.memory_space<vmem>>, vector<128x128xbf16>
    %cst_20 = arith.constant dense<0.000000e+00> : vector<8x128xf32>
    %28 = tpu.matmul %26, %27, %cst_20 {dimension_numbers = #tpu.dot_dimension_numbers<[1], [0], [0], [1], [0, 0, 1, 1], [], []>} : vector<8x128xbf16>, vector<128x128xbf16>, vector<8x128xf32> -> vector<8x128xf32>
    %c0_21 = arith.constant 0 : index
    %c0_22 = arith.constant 0 : index
    %29 = vector.load %arg9[%c0_21, %c0_22] : memref<1x128xf32, #tpu.memory_space<vmem>>, vector<1x128xf32>
    %30 = vector.broadcast %29 : vector<1x128xf32> to vector<8x128xf32>
    %31 = arith.addf %28, %30 : vector<8x128xf32>
    %cst_23 = arith.constant 0.000000e+00 : f32
    %32 = vector.broadcast %cst_23 : f32 to vector<8x128xf32>
    %33 = arith.maximumf %31, %32 : vector<8x128xf32>
    %34 = arith.truncf %33 : vector<8x128xf32> to vector<8x128xbf16>
    %c0_24 = arith.constant 0 : index
    %c0_25 = arith.constant 0 : index
    %35 = vector.load %arg10[%c0_24, %c0_25] : memref<128x8xbf16, #tpu.memory_space<vmem>>, vector<128x8xbf16>
    %cst_26 = arith.constant dense<0.000000e+00> : vector<8x8xf32>
    %36 = tpu.matmul %34, %35, %cst_26 {dimension_numbers = #tpu.dot_dimension_numbers<[1], [0], [0], [1], [0, 0, 1, 1], [], []>} : vector<8x128xbf16>, vector<128x8xbf16>, vector<8x8xf32> -> vector<8x8xf32>
    %c0_27 = arith.constant 0 : index
    %c0_28 = arith.constant 0 : index
    %37 = vector.load %arg11[%c0_27, %c0_28] : memref<1x8xf32, #tpu.memory_space<vmem>>, vector<1x8xf32>
    %38 = vector.broadcast %37 : vector<1x8xf32> to vector<8x8xf32>
    %39 = arith.addf %36, %38 : vector<8x8xf32>
    %cst_29 = arith.constant dense<0xFF800000> : vector<8xf32>
    %40 = vector.multi_reduction <maximumf>, %39, %cst_29 [1] : vector<8x8xf32> to vector<8xf32>
    %41 = vector.shape_cast %40 : vector<8xf32> to vector<8x1xf32>
    %42 = vector.broadcast %41 : vector<8x1xf32> to vector<8x8xf32>
    %43 = arith.subf %39, %42 : vector<8x8xf32>
    %44 = math.exp %43 : vector<8x8xf32>
    %cst_30 = arith.constant dense<0.000000e+00> : vector<8xf32>
    %45 = vector.multi_reduction <add>, %44, %cst_30 [1] : vector<8x8xf32> to vector<8xf32>
    %46 = vector.shape_cast %45 : vector<8xf32> to vector<8x1xf32>
    %47 = math.log %46 : vector<8x1xf32>
    %48 = vector.broadcast %47 : vector<8x1xf32> to vector<8x8xf32>
    %49 = arith.subf %43, %48 : vector<8x8xf32>
    %c0_31 = arith.constant 0 : index
    %c0_32 = arith.constant 0 : index
    %50 = vector.load %arg12[%c0_31, %c0_32] : memref<8x8xf32, #tpu.memory_space<vmem>>, vector<8x8xf32>
    tpu.vector_store %arg12[%c0_31, %c0_32], %49 {strides = array<i32>} : memref<8x8xf32, #tpu.memory_space<vmem>>, vector<8x8xf32>,
    return
  }
  func.func @transform_0(%arg0: i32) -> (i32, i32) {
    %c0_i32 = arith.constant 0 : i32
    %c0_i32_0 = arith.constant 0 : i32
    return %arg0, %c0_i32 : i32, i32
  }
  func.func @transform_1(%arg0: i32) -> (i32, i32) {
    %c0_i32 = arith.constant 0 : i32
    %c0_i32_0 = arith.constant 0 : i32
    %c0_i32_1 = arith.constant 0 : i32
    return %c0_i32, %c0_i32_0 : i32, i32
  }
  func.func @transform_2(%arg0: i32) -> (i32, i32) {
    %c0_i32 = arith.constant 0 : i32
    %c0_i32_0 = arith.constant 0 : i32
    %c0_i32_1 = arith.constant 0 : i32
    return %c0_i32, %c0_i32_0 : i32, i32
  }
  func.func @transform_3(%arg0: i32) -> (i32, i32) {
    %c0_i32 = arith.constant 0 : i32
    %c0_i32_0 = arith.constant 0 : i32
    %c0_i32_1 = arith.constant 0 : i32
    return %c0_i32, %c0_i32_0 : i32, i32
  }
  func.func @transform_4(%arg0: i32) -> (i32, i32) {
    %c0_i32 = arith.constant 0 : i32
    %c0_i32_0 = arith.constant 0 : i32
    %c0_i32_1 = arith.constant 0 : i32
    return %c0_i32, %c0_i32_0 : i32, i32
  }
  func.func @transform_5(%arg0: i32) -> (i32, i32) {
    %c0_i32 = arith.constant 0 : i32
    %c0_i32_0 = arith.constant 0 : i32
    %c0_i32_1 = arith.constant 0 : i32
    return %c0_i32, %c0_i32_0 : i32, i32
  }
  func.func @transform_6(%arg0: i32) -> (i32, i32) {
    %c0_i32 = arith.constant 0 : i32
    %c0_i32_0 = arith.constant 0 : i32
    %c0_i32_1 = arith.constant 0 : i32
    return %c0_i32, %c0_i32_0 : i32, i32
  }
  func.func @transform_7(%arg0: i32) -> (i32, i32) {
    %c0_i32 = arith.constant 0 : i32
    %c0_i32_0 = arith.constant 0 : i32
    %c0_i32_1 = arith.constant 0 : i32
    return %c0_i32, %c0_i32_0 : i32, i32
  }
  func.func @transform_8(%arg0: i32) -> (i32, i32) {
    %c0_i32 = arith.constant 0 : i32
    %c0_i32_0 = arith.constant 0 : i32
    %c0_i32_1 = arith.constant 0 : i32
    return %c0_i32, %c0_i32_0 : i32, i32
  }
  func.func @transform_9(%arg0: i32) -> (i32, i32) {
    %c0_i32 = arith.constant 0 : i32
    %c0_i32_0 = arith.constant 0 : i32
    %c0_i32_1 = arith.constant 0 : i32
    return %c0_i32, %c0_i32_0 : i32, i32
  }
  func.func @transform_10(%arg0: i32) -> (i32, i32) {
    %c0_i32 = arith.constant 0 : i32
    %c0_i32_0 = arith.constant 0 : i32
    %c0_i32_1 = arith.constant 0 : i32
    return %c0_i32, %c0_i32_0 : i32, i32
  }
  func.func @transform_11(%arg0: i32) -> (i32, i32) {
    %c0_i32 = arith.constant 0 : i32
    %c0_i32_0 = arith.constant 0 : i32
    return %arg0, %c0_i32 : i32, i32
  }
}

</mosaic_0001>

<bundles_post_ra>
// kernel: tpu_custom_call.1
= control target key start
LH: loop header
LB: loop body
LE: loop exit
PB: predicated region body
PF: predicated region fallthrough
CT: control target
= control target key end

     0   :  { %16 = vsyncpa [#allocation3], 0  ;;  %s1190_s0 = inlined_call_operand.vmem [shape: f32[8,32], index: 0, kind: input, shape index: {}]   ;;  %s1191_s1 = inlined_call_operand.hbm [shape: bf16[32,128], index: 1, kind: input, shape index: {}]   ;;  %s1192_s2 = inlined_call_operand.vmem [shape: f32[1,128], index: 2, kind: input, shape index: {}]   ;;  %s1193_s3 = inlined_call_operand.vmem [shape: bf16[128,128], index: 3, kind: input, shape index: {}]   ;;  %s1194_s4 = inlined_call_operand.vmem [shape: f32[1,128], index: 4, kind: input, shape index: {}]   ;;  %s1195_s5 = inlined_call_operand.hbm [shape: bf16[128,128], index: 5, kind: input, shape index: {}]   ;;  %s1196_s6 = inlined_call_operand.vmem [shape: f32[1,128], index: 6, kind: input, shape index: {}]   ;;  %s1197_s7 = inlined_call_operand.hbm [shape: bf16[128,128], index: 7, kind: input, shape index: {}]   ;;  %s1198_s8 = inlined_call_operand.vmem [shape: f32[1,128], index: 8, kind: input, shape index: {}]   ;;  %s1199_s9 = inlined_call_operand.vmem [shape: bf16[128,8], index: 9, kind: input, shape index: {}]   ;;  %s1200_s10 = inlined_call_operand.vmem [shape: f32[1,8], index: 10, kind: input, shape index: {}]   ;;  %s1201_s11 = inlined_call_operand.hbm [shape: f32[8,8], index: 11, kind: output, shape index: {}]  }
   0x1   :  { %17 = vsyncpa [#allocation6], 0 }
   0x2   :  { %18 = vsyncpa [#allocation4], 0  ;;  %s940_s17 = smov [#allocation5]   ;;  %s941_s19 = smov [#allocation2]  }
   0x3   :  { %s44_s18 = sshll.u32 %s940_s17, 4  ;;  %s26_s20 = sshll.u32 %s941_s19, 4  ;;  %s45_s18 = int_to_ptr.vmem [resolvable:$true] %s44_s18  ;;  %s1008_s20 = int_to_ptr.vmem [resolvable:$true] %s26_s20 }
   0x4   :  { %s846_s23 = scalar_lea.hbm %s1195_s5, 1024 }
   0x5   :  { %p847_p0 = scmp.ne.s32.totalorder %s1195_s5, %s846_s23  ;;  %p850_p1 = scmp.lt.u32.totalorder %s846_s23, %s1195_s5 }
   0x7   :  { %p852_p2 = pnand %p850_p1, %p847_p0 }
   0x9   :  { %855 = shalt.err (!%p852_p2)
}
   0xa   :  { %s856_s28 = scalar_lea.vmem %s45_s18, 1024  ;;  %p861_p4 = scmp.lt.s32.totalorder %s45_s18, %s45_s18 }
   0xb   :  { %p857_p3 = scmp.ne.s32.totalorder %s45_s18, %s856_s28  ;;  %p862_p5 = scmp.lt.s32.totalorder %s856_s28, %s856_s28 }
   0xd   :  { %p863_p6 = por %p862_p5, %p861_p4 }
   0xf   :  { %p864_p7 = pnand %p863_p6, %p857_p3 }
  0x11   :  { %867 = shalt.err (!%p864_p7)
}
  0x12   :  { %s942_s29 = smov 64   ;;  %s943_s30 = smov 4  }
  0x13   :  { %50 = dma.hbm_to_vmem [thread:$0]  %s1195_s5, 1024, %s45_s18, [#allocation6], %s942_s29, %s942_s29, %s943_s30  }
  0x14   :  { %s868_s16 = scalar_lea.hbm %s1191_s1, 256 }
  0x15   :  { %p869_p8 = scmp.ne.s32.totalorder %s1191_s1, %s868_s16  ;;  %p872_p9 = scmp.lt.u32.totalorder %s868_s16, %s1191_s1 }
  0x17   :  { %p874_p10 = pnand %p872_p9, %p869_p8 }
  0x19   :  { %877 = shalt.err (!%p874_p10)
}
  0x1a   :  { %s878_s23 = scalar_lea.vmem %s1008_s20, 256  ;;  %p883_p12 = scmp.lt.s32.totalorder %s1008_s20, %s1008_s20 }
  0x1b   :  { %p879_p11 = scmp.ne.s32.totalorder %s1008_s20, %s878_s23  ;;  %p884_p13 = scmp.lt.s32.totalorder %s878_s23, %s878_s23 }
  0x1d   :  { %p885_p0 = por %p884_p13, %p883_p12 }
  0x1f   :  { %p886_p1 = pnand %p885_p0, %p879_p11 }
  0x21   :  { %889 = shalt.err (!%p886_p1)
}
  0x22   :  { %32 = dma.hbm_to_vmem [thread:$0]  %s1191_s1, 256, %s1008_s20, [#allocation3], %s942_s29, %s942_s29, %s943_s30  }
  0x23   :  { %s944_s24 = smov [#allocation7]   ;;  %s890_s28 = scalar_lea.hbm %s1197_s7, 1024 }
  0x24   :  { %s58_s25 = sshll.u32 %s944_s24, 4  ;;  %p891_p2 = scmp.ne.s32.totalorder %s1197_s7, %s890_s28  ;;  %s59_s25 = int_to_ptr.vmem [resolvable:$true] %s58_s25 }
  0x25   :  { %p894_p3 = scmp.lt.u32.totalorder %s890_s28, %s1197_s7 }
  0x27   :  { %p896_p4 = pnand %p894_p3, %p891_p2 }
  0x29   :  { %899 = shalt.err (!%p896_p4)
}
  0x2a   :  { %s900_s16 = scalar_lea.vmem %s59_s25, 1024  ;;  %p905_p6 = scmp.lt.s32.totalorder %s59_s25, %s59_s25 }
  0x2b   :  { %p901_p5 = scmp.ne.s32.totalorder %s59_s25, %s900_s16  ;;  %p906_p7 = scmp.lt.s32.totalorder %s900_s16, %s900_s16 }
  0x2d   :  { %p907_p8 = por %p906_p7, %p905_p6 }
  0x2f   :  { %p908_p9 = pnand %p907_p8, %p901_p5 }
  0x31   :  { %911 = shalt.err (!%p908_p9)
}
  0x32   :  { %64 = dma.hbm_to_vmem [thread:$0]  %s1197_s7, 1024, %s59_s25, [#allocation6], %s942_s29, %s942_s29, %s943_s30  }
  0x33   :  { %934 = dma.done.wait [#allocation3], 256  }
  0x34   :  { %935 = vsyncadd [#allocation3], 4294967040 }
  0x35   :  { %936 = dma.done.wait [#allocation6], 2048  }
  0x36   :  { %937 = vsyncadd [#allocation6], 4294965248  ;;  %v945_v0 = vmov 0.0   ;;  %vm946_vm0 = vmmov 0   ;;  %v808_v1 = vld [vmem:[#allocation2] sm:$0xff]   ;;  %v809_v2 = vld [vmem:[#allocation2 + $0x8] sm:$0xff]  }
  0x37   :  { %712 = vmatprep.subr.bf16.mxu0 %v945_v0  ;;  %716 = vmatprep.mubr.msk.bf16.mxu0 %vm946_vm0, %v945_v0  ;;  %v81_v3 = vld [vmem:[%s1190_s0] sm:$0xff]  ;;  %v811_v6 = vld [vmem:[%s1193_s3 + $0x8] sm:$0xff]   ;;  %vm106_vm1 = vcmask 261120   ;;  %v812_v7 = vld [vmem:[%s1193_s3 + $0x10] sm:$0xff]   ;;  %vm603_vm2 = vcmask 64512  }
  0x38   :  { %720 = vmatprep.subr.bf16.mxu1 %v945_v0  ;;  %736 = vmatprep.mubr.msk.bf16.mxu1 %vm946_vm0, %v945_v0  ;;  %v810_v4 = vld [vmem:[%s1193_s3] sm:$0xff]   ;;  %v82_v5 = vpack.c.bf16 %v81_v3, %v81_v3  ;;  %v813_v8 = vld [vmem:[%s1193_s3 + $0x18] sm:$0xff]   ;;  %v815_v10 = vld [vmem:[%s1193_s3 + $0x28] sm:$0xff]  }
  0x39   :  { %713 = vmatpush3.bf16.msra.mxu0 %v808_v1  ;;  %721 = vmatpush3.bf16.msra.mxu1 %v810_v4  ;;  %v814_v9 = vld [vmem:[%s1193_s3 + $0x20] sm:$0xff]   ;;  %v816_v11 = vld [vmem:[%s1193_s3 + $0x30] sm:$0xff]   ;;  %v817_v12 = vld [vmem:[%s1193_s3 + $0x38] sm:$0xff]  }
  0x3a   :  { %714 = vmatprep.subr.bf16.mxu0 %v945_v0  ;;  %722 = vmatprep.subr.bf16.mxu1 %v945_v0  ;;  %v818_v13 = vld [vmem:[#allocation5] sm:$0xff]   ;;  %v819_v14 = vld [vmem:[#allocation5 + $0x8] sm:$0xff]   ;;  %v820_v15 = vld [vmem:[#allocation5 + $0x10] sm:$0xff]  }
  0x3b   :  { %v821_v16 = vld [vmem:[#allocation5 + $0x18] sm:$0xff]   ;;  %v822_v17 = vld [vmem:[#allocation5 + $0x20] sm:$0xff]   ;;  %v823_v18 = vld [vmem:[#allocation5 + $0x28] sm:$0xff]  }
  0x3c   :  { %v633_v19 = vld [vmem:[%s1192_s2] ss:$0 sm:$0xff]  ;;  %v825_v28 = vld [vmem:[#allocation5 + $0x38] sm:$0xff]   ;;  %v826_v29 = vld [vmem:[#allocation7] sm:$0xff]  }
  0x3d   :  { %715 = vmatpush3.bf16.msra.mxu0 %v809_v2  ;;  %723 = vmatpush3.bf16.msra.mxu1 %v811_v6  ;;  %v824_v27 = vld [vmem:[#allocation5 + $0x30] sm:$0xff]   ;;  %v827_v30 = vld [vmem:[#allocation7 + $0x8] sm:$0xff]   ;;  %v829_v32 = vld [vmem:[#allocation7 + $0x18] sm:$0xff]  }
  0x3e   :  { %740 = vmatprep.subr.bf16.mxu0 %v945_v0  ;;  %724 = vmatprep.subr.bf16.mxu1 %v945_v0  ;;  %v828_v31 = vld [vmem:[#allocation7 + $0x10] sm:$0xff]   ;;  %v830_v33 = vld [vmem:[#allocation7 + $0x20] sm:$0xff]   ;;  %v831_v34 = vld [vmem:[#allocation7 + $0x28] sm:$0xff]  }
  0x3f   :  { %v637_v35 = vld [vmem:[%s1194_s4] ss:$0 sm:$0xff]  ;;  %v833_v44 = vld [vmem:[#allocation7 + $0x38] sm:$0xff]   ;;  %v836_v47 = vld [vmem:[%s1199_s9 + $0x10] sm:$0xff]  }
  0x40   :  { %717 = vmatmul.mubr.msk.bf16.vlgmr.msra.gmra.mrb[0].mxu0 %vm106_vm1, %v82_v5  ;;  %v832_v43 = vld [vmem:[#allocation7 + $0x30] sm:$0xff]   ;;  %v835_v46 = vld [vmem:[%s1199_s9 + $0x8] sm:$0xff]   ;;  %v837_v48 = vld [vmem:[%s1199_s9 + $0x18] sm:$0xff]  }
  0x41   :  { %756 = vmatprep.mubr.msk.bf16.mxu0 %vm946_vm0, %v945_v0  ;;  %725 = vmatpush3.bf16.msra.mxu1 %v812_v7  ;;  %v834_v45 = vld [vmem:[%s1199_s9] sm:$0xff]   ;;  %v839_v50 = vld [vmem:[%s1199_s9 + $0x28] sm:$0xff]   ;;  %v840_v60 = vld [vmem:[%s1199_s9 + $0x30] sm:$0xff]  }
  0x42   :  { %726 = vmatprep.subr.bf16.mxu1 %v945_v0  ;;  %741 = vmatpush3.bf16.msra.mxu0 %v818_v13  ;;  %v838_v49 = vld [vmem:[%s1199_s9 + $0x20] sm:$0xff]   ;;  %v841_v61 = vld [vmem:[%s1199_s9 + $0x38] sm:$0xff]  }
  0x43   :  { %742 = vmatprep.subr.bf16.mxu0 %v945_v0  ;;  %v646_v51 = vld [vmem:[%s1196_s6] ss:$0 sm:$0xff] }
  0x44   :  { %v655_v62 = vld [vmem:[%s1198_s8] ss:$0 sm:$0xff]  ;;  %s947_s8 = smov [#allocation8]  }
  0x45   :  { %727 = vmatpush3.bf16.msra.mxu1 %v813_v8  ;;  %s623_s9 = sshll.u32 %s947_s8, 4  ;;  %s624_s9 = int_to_ptr.vmem [resolvable:$true] %s623_s9 }
  0x46   :  { %728 = vmatprep.subr.bf16.mxu1 %v945_v0  ;;  %743 = vmatpush3.bf16.msra.mxu0 %v819_v14  ;;  %p917_p11 = scmp.lt.s32.totalorder %s624_s9, %s624_s9 }
  0x47   :  { %744 = vmatprep.subr.bf16.mxu0 %v945_v0 }
  0x49   :  { %729 = vmatpush3.bf16.msra.mxu1 %v814_v9 }
  0x4a   :  { %730 = vmatprep.subr.bf16.mxu1 %v945_v0  ;;  %745 = vmatpush3.bf16.msra.mxu0 %v820_v15 }
  0x4b   :  { %746 = vmatprep.subr.bf16.mxu0 %v945_v0 }
  0x4d   :  { %731 = vmatpush3.bf16.msra.mxu1 %v815_v10 }
  0x4e   :  { %732 = vmatprep.subr.bf16.mxu1 %v945_v0  ;;  %747 = vmatpush3.bf16.msra.mxu0 %v821_v16 }
  0x4f   :  { %748 = vmatprep.subr.bf16.mxu0 %v945_v0 }
  0x51   :  { %733 = vmatpush3.bf16.msra.mxu1 %v816_v11 }
  0x52   :  { %734 = vmatprep.subr.bf16.mxu1 %v945_v0  ;;  %749 = vmatpush3.bf16.msra.mxu0 %v822_v17 }
  0x53   :  { %750 = vmatprep.subr.bf16.mxu0 %v945_v0 }
  0x55   :  { %735 = vmatpush3.bf16.msra.mxu1 %v817_v12 }
  0x56   :  { %760 = vmatprep.subr.bf16.mxu1 %v945_v0  ;;  %751 = vmatpush3.bf16.msra.mxu0 %v823_v18 }
  0x57   :  { %752 = vmatprep.subr.bf16.mxu0 %v945_v0 }
  0x5a   :  { %753 = vmatpush3.bf16.msra.mxu0 %v824_v27 }
  0x5b   :  { %754 = vmatprep.subr.bf16.mxu0 %v945_v0 }
  0x5e   :  { %755 = vmatpush3.bf16.msra.mxu0 %v825_v28 }
  0x5f   :  { %780 = vmatprep.subr.bf16.mxu0 %v945_v0 }
 0x113   :  { %v144_v20 = vpop.f32.mrb[0].mxu0 }
 0x114   :  { %v145_v21 = vadd.f32 %v633_v19, %v144_v20  ;;  %v718_v22 = vpop.f32.mrb[1].mxu0 }
 0x115   :  { %v147_v23 = vpop.f32.mrb[2].mxu0 }
 0x116   :  { %v1114_v24 = vmax.f32 %v145_v21, 0.0  ;;  %v719_v25 = vpop.f32.mrb[3].mxu0 }
 0x118   :  { %v151_v26 = vpack.c.bf16 %v1114_v24, %v1114_v24 }
 0x11a   :  { %737 = vmatmul.mubr.bf16.vlgmr.msra.gmra.mrb[0].mxu1 %v151_v26 }
 0x11b   :  { %776 = vmatprep.mubr.msk.bf16.mxu1 %vm946_vm0, %v945_v0  ;;  %761 = vmatpush3.bf16.msra.mxu1 %v826_v29 }
 0x11c   :  { %762 = vmatprep.subr.bf16.mxu1 %v945_v0 }
 0x11f   :  { %763 = vmatpush3.bf16.msra.mxu1 %v827_v30 }
 0x120   :  { %764 = vmatprep.subr.bf16.mxu1 %v945_v0 }
 0x123   :  { %765 = vmatpush3.bf16.msra.mxu1 %v828_v31 }
 0x124   :  { %766 = vmatprep.subr.bf16.mxu1 %v945_v0 }
 0x127   :  { %767 = vmatpush3.bf16.msra.mxu1 %v829_v32 }
 0x128   :  { %768 = vmatprep.subr.bf16.mxu1 %v945_v0 }
 0x12b   :  { %769 = vmatpush3.bf16.msra.mxu1 %v830_v33 }
 0x12c   :  { %770 = vmatprep.subr.bf16.mxu1 %v945_v0 }
 0x12f   :  { %771 = vmatpush3.bf16.msra.mxu1 %v831_v34 }
 0x130   :  { %772 = vmatprep.subr.bf16.mxu1 %v945_v0 }
 0x133   :  { %773 = vmatpush3.bf16.msra.mxu1 %v832_v43 }
 0x134   :  { %774 = vmatprep.subr.bf16.mxu1 %v945_v0 }
 0x137   :  { %775 = vmatpush3.bf16.msra.mxu1 %v833_v44 }
 0x1ed   :  { %v257_v36 = vpop.f32.mrb[0].mxu1 }
 0x1ee   :  { %v258_v37 = vadd.f32 %v637_v35, %v257_v36  ;;  %v738_v38 = vpop.f32.mrb[1].mxu1 }
 0x1ef   :  { %v260_v39 = vpop.f32.mrb[2].mxu1 }
 0x1f0   :  { %v263_v40 = vmax.f32 %v258_v37, 0.0  ;;  %v739_v41 = vpop.f32.mrb[3].mxu1 }
 0x1f2   :  { %v264_v42 = vpack.c.bf16 %v263_v40, %v263_v40 }
 0x1f4   :  { %757 = vmatmul.mubr.bf16.vlgmr.msra.gmra.mrb[4].mxu0 %v264_v42 }
 0x1f5   :  { %796 = vmatprep.mubr.msk.bf16.mxu0 %vm946_vm0, %v945_v0  ;;  %781 = vmatpush3.bf16.msra.mxu0 %v834_v45 }
 0x1f6   :  { %782 = vmatprep.subr.bf16.mxu0 %v945_v0 }
 0x1f9   :  { %783 = vmatpush3.bf16.msra.mxu0 %v835_v46 }
 0x1fa   :  { %784 = vmatprep.subr.bf16.mxu0 %v945_v0 }
 0x1fd   :  { %785 = vmatpush3.bf16.msra.mxu0 %v836_v47 }
 0x1fe   :  { %786 = vmatprep.subr.bf16.mxu0 %v945_v0 }
 0x201   :  { %787 = vmatpush3.bf16.msra.mxu0 %v837_v48 }
 0x202   :  { %788 = vmatprep.subr.bf16.mxu0 %v945_v0 }
 0x205   :  { %789 = vmatpush3.bf16.msra.mxu0 %v838_v49 }
 0x206   :  { %790 = vmatprep.subr.bf16.mxu0 %v945_v0 }
 0x209   :  { %791 = vmatpush3.bf16.msra.mxu0 %v839_v50 }
 0x20a   :  { %792 = vmatprep.subr.bf16.mxu0 %v945_v0 }
 0x20d   :  { %793 = vmatpush3.bf16.msra.mxu0 %v840_v60 }
 0x20e   :  { %794 = vmatprep.subr.bf16.mxu0 %v945_v0  ;;  %v664_v0 = vld [vmem:[%s1200_s10] ss:$0 sm:$0xff]  ;;  %s912_s10 = scalar_lea.vmem %s624_s9, 128 }
 0x20f   :  { %p913_p10 = scmp.ne.s32.totalorder %s624_s9, %s912_s10  ;;  %p918_p12 = scmp.lt.s32.totalorder %s912_s10, %s912_s10 }
 0x211   :  { %795 = vmatpush3.bf16.msra.mxu0 %v841_v61  ;;  %p919_p13 = por %p918_p12, %p917_p11 }
 0x213   :  { %p920_p0 = pnand %p919_p13, %p913_p10 }
 0x2c7   :  { %v370_v52 = vpop.f32.mrb[4].mxu0 }
 0x2c8   :  { %v371_v53 = vadd.f32 %v646_v51, %v370_v52  ;;  %v758_v54 = vpop.f32.mrb[5].mxu0 }
 0x2c9   :  { %v373_v55 = vpop.f32.mrb[6].mxu0 }
 0x2ca   :  { %v376_v56 = vadd.f32 %v371_v53, %v1114_v24  ;;  %v759_v57 = vpop.f32.mrb[7].mxu0 }
 0x2cc   :  { %v377_v58 = vmax.f32 %v376_v56, 0.0 }
 0x2ce   :  { %v378_v59 = vpack.c.bf16 %v377_v58, %v377_v58 }
 0x2d0   :  { %777 = vmatmul.mubr.bf16.vlgmr.msra.gmra.mrb[4].mxu1 %v378_v59 }
 0x3a3   :  { %v484_v63 = vpop.f32.mrb[4].mxu1 }
 0x3a4   :  { %v485_v1 = vadd.f32 %v655_v62, %v484_v63  ;;  %v778_v2 = vpop.f32.mrb[5].mxu1 }
 0x3a5   :  { %v487_v3 = vpop.f32.mrb[6].mxu1 }
 0x3a6   :  { %v490_v4 = vmax.f32 %v485_v1, 0.0  ;;  %v779_v5 = vpop.f32.mrb[7].mxu1 }
 0x3a8   :  { %v491_v6 = vpack.c.bf16 %v490_v4, %v490_v4 }
 0x3aa   :  { %797 = vmatmul.mubr.bf16.vlgmr.msra.gmra.mrb[8].mxu0 %v491_v6 }
 0x47d   :  { %v597_v7 = vpop.f32.mrb[8].mxu0 }
 0x47e   :  { %v598_v8 = vadd.f32 %v664_v0, %v597_v7  ;;  %v798_v9 = vpop.f32.mrb[9].mxu0 }
 0x47f   :  { %v600_v10 = vpop.f32.mrb[10].mxu0 }
 0x480   :  { %v799_v11 = vpop.f32.mrb[11].mxu0  ;;  %v604_v12 = vsel %vm603_vm2, %v598_v8, -inf }
 0x481   :  { %605 = vmax.xlane.f32.xlu0 %v604_v12 }
 0x50e   :  { %v606_v13 = vpop.xlane.xlu0 %605 }
 0x50f   :  { %v607_v14 = vsub.f32 %v598_v8, %v606_v13 }
 0x511   :  { %v608_v15 = vmul.f32 1.442695, %v607_v14 }
 0x513   :  { %842 = vpow2.f32 %v608_v15 }
 0x51d   :  { %v843_v16 = vpop.eup %842 }
 0x51e   :  { %v610_v17 = vsel %vm603_vm2, %v843_v16, 0.0 }
 0x51f   :  { %611 = vadd.xlane.f32.xlu0 %v610_v17 }
 0x5ac   :  { %v612_v18 = vpop.xlane.xlu0 %611 }
 0x5ad   :  { %844 = vlog2.f32 %v612_v18 }
 0x5b7   :  { %v845_v19 = vpop.eup %844 }
 0x5b8   :  { %v614_v20 = vmul.f32 0.6931472, %v845_v19 }
 0x5ba   :  { %v615_v21 = vsub.f32 %v607_v14, %v614_v20 }
 0x5bc   :  { %616 = vst.msk [vmem:[#allocation8] sm:$0xff] %vm603_vm2, %v615_v21 }
 0x5bd   :  { %923 = shalt.err (!%p920_p0)
}
 0x5be   :  { %s924_s14 = scalar_lea.hbm %s1201_s11, 128 }
 0x5bf   :  { %p925_p1 = scmp.ne.s32.totalorder %s1201_s11, %s924_s14  ;;  %p928_p2 = scmp.lt.u32.totalorder %s924_s14, %s1201_s11 }
 0x5c1   :  { %p930_p3 = pnand %p928_p2, %p925_p1 }
 0x5c3   :  { %933 = shalt.err (!%p930_p3)
}
 0x5c4   :  { %626 = dma.vmem_to_hbm [thread:$0]  %s624_s9, 128, %s1201_s11, [#allocation4]  }
 0x5c5   :  { %938 = dma.done.wait [#allocation4], 128  }
 0x5c6   :  { %939 = vsyncadd [#allocation4], 4294967168 }
 0x5c7   :  { %630 = vsyncpa [#allocation3], 1 }
 0x5c8   :  { %631 = vsyncpa [#allocation6], 1 }
 0x5c9   :  { %632 = vsyncpa [#allocation4], 1 }

</bundles_post_ra>
